<compile_context>
chip_gen: v7x
topology: tpu7x:2x2x1
jax: 0.10.0
libtpu: 0.0.40
codegen_flags: <defaults>
</compile_context>

<pallas_src>
import math

import jax
import jax.numpy as jnp
from jax.experimental import pallas as pl
from jax.experimental.pallas import tpu as pltpu


# ---------------------------------------------------------------------------
# "register_buffer" setup -- identical math to the PyTorch __init__.
# ---------------------------------------------------------------------------
def make_pe(max_len, d_model, dtype=jnp.float32):
    position = jnp.arange(max_len, dtype=jnp.float32)[:, None]
    div_term = jnp.exp(
        jnp.arange(0, d_model, 2, dtype=jnp.float32) * (-math.log(10000.0) / d_model)
    )
    pe = jnp.zeros((max_len, d_model), jnp.float32)
    pe = pe.at[:, 0::2].set(jnp.sin(position * div_term))
    # Slice div_term for the cos half so odd d_model also works
    # (pe[:, 1::2] has floor(D/2) columns).
    pe = pe.at[:, 1::2].set(jnp.cos(position * div_term[: d_model // 2]))
    return pe.astype(dtype)


# ---------------------------------------------------------------------------
# Kernel: elementwise add of a (b_tile, l_tile) x block and a (1, l_tile) PE
# block, broadcast over the batch rows in-register.
# ---------------------------------------------------------------------------
def _pos_enc_kernel(x_ref, pe_ref, o_ref):
    o_ref[...] = x_ref[...] + pe_ref[...]


def positional_encoding(x, pe, *, target_block_bytes=2 << 20):
    """x: [B, T, D]; pe: [max_len, D] buffer with max_len >= T."""
    B, T, D = x.shape
    max_len, d_pe = pe.shape
    assert d_pe == D and max_len >= T, "pe buffer too small for the input"

    if pe.dtype != x.dtype:
        pe = pe.astype(x.dtype)

    # Lane-dense view: collapse (T, D) -> L.  The PE broadcast is only over the
    # batch axis, so collapsing T and D is legal; contiguous reshapes are free.
    L = T * D
    x2 = x.reshape(B, L)
    itemsize = jnp.dtype(x.dtype).itemsize
    target_elems = max(128, target_block_bytes // itemsize)

    if L % 128 == 0:
        # No pre-slice: flatten the whole buffer; the index_map never selects
        # blocks past the first ceil(L / l_tile) ones.
        pe_flat = pe.reshape(1, max_len * D)
        l_tile = min(L, max(128, (min(L, target_elems) // 128) * 128))
    else:
        # Fallback: last axis not lane-alignable -> single full-extent block
        # (tiny slice copy; only hit when T*D is not a multiple of 128).
        pe_flat = jax.lax.slice(pe, (0, 0), (T, D)).reshape(1, L)
        l_tile = L

    # Put several batch rows in one block (bigger DMAs, fewer grid steps).
    b_tile = max(1, min(B, target_elems // l_tile))
    if b_tile < B:
        if B < 8:
            b_tile = B
        else:
            # Keep the sublane (second-minor) block dim a multiple of 8.
            b_tile = max(8, (b_tile // 8) * 8)
            if L % 128 == 0:
                # Re-shrink l_tile so the block stays near the VMEM budget.
                l_tile = min(l_tile, max(128, ((target_elems // b_tile) // 128) * 128))

    n_l = pl.cdiv(L, l_tile)
    n_b = pl.cdiv(B, b_tile)

    # Guard (rare): never let the last PE block index past the buffer when the
    # flattened tiling overshoots T*D.
    needed = n_l * l_tile
    if needed > pe_flat.shape[1]:
        pe_flat = jnp.pad(pe_flat, ((0, 0), (0, needed - pe_flat.shape[1])))

    out = pl.pallas_call(
        _pos_enc_kernel,
        out_shape=jax.ShapeDtypeStruct((B, L), x.dtype),
        # Batch blocks are the fastest axis and the PE index_map ignores them,
        # so the PE block stays resident across consecutive grid steps.
        grid=(n_l, n_b),
        in_specs=[
            pl.BlockSpec((b_tile, l_tile), lambda l, b: (b, l)),   # x tile
            pl.BlockSpec((1, l_tile), lambda l, b: (0, l)),        # pe tile
        ],
        out_specs=pl.BlockSpec((b_tile, l_tile), lambda l, b: (b, l)),
        compiler_params=pltpu.CompilerParams(
            # Every (l, b) block is independent -> both axes parallel; lets the
            # v7x megacore split the grid across its two TensorCores.
            dimension_semantics=("parallel", "parallel"),
        ),
    )(x2, pe_flat)

    return out.reshape(B, T, D)


# ---------------------------------------------------------------------------
if __name__ == "__main__":
    key = jax.random.PRNGKey(0)

    # Case 1: module-scale shapes (d_model=32 < 128 -> flattened lane-dense path).
    B, T, D, MAX_LEN = 2, 8, 32, 64
    x = jax.random.normal(key, (B, T, D), jnp.float32)
    pe = make_pe(MAX_LEN, D)
    out = positional_encoding(x, pe)
    jax.block_until_ready(out)
    ref = x + pe[None, :T, :]
    assert out.shape == (B, T, D)
    assert bool(jnp.allclose(out, ref, rtol=1e-6, atol=1e-6))

    # Case 2: multiple flattened blocks with a non-divisible remainder
    # (L = 40*64 = 2560, l_tile forced to 1024 -> last block input-padded /
    # output-masked) and a PE buffer longer than T (no pre-slice path).
    B2, T2, D2, MAX2 = 2, 40, 64, 50
    x2 = jax.random.normal(jax.random.PRNGKey(0), (B2, T2, D2), jnp.float32)
    pe2 = make_pe(MAX2, D2)
    out2 = positional_encoding(x2, pe2, target_block_bytes=1024 * 4)
    jax.block_until_ready(out2)
    ref2 = x2 + pe2[None, :T2, :]
    assert bool(jnp.allclose(out2, ref2, rtol=1e-6, atol=1e-6))

    # Case 3: T*D not a multiple of 128 -> full-extent fallback block.
    B3, T3, D3, MAX3 = 2, 5, 24, 10
    x3 = jax.random.normal(jax.random.PRNGKey(0), (B3, T3, D3), jnp.float32)
    pe3 = make_pe(MAX3, D3)
    out3 = positional_encoding(x3, pe3)
    jax.block_until_ready(out3)
    ref3 = x3 + pe3[None, :T3, :]
    assert bool(jnp.allclose(out3, ref3, rtol=1e-6, atol=1e-6))

    print("KERNEL_OK")
</pallas_src>

<mosaic_0001>
module attributes {stable_mosaic.version = 11 : i64} {
  func.func @_pos_enc_kernel(%arg0: i32, %arg1: i32, %arg2: memref<2x256xf32, #tpu.memory_space<vmem>>, %arg3: memref<1x256xf32, #tpu.memory_space<vmem>>, %arg4: memref<2x256xf32, #tpu.memory_space<vmem>>) attributes {dimension_semantics = [#tpu.dimension_semantics<parallel>, #tpu.dimension_semantics<parallel>], iteration_bounds = array<i64: 1, 1>, scalar_prefetch = 0 : i64, scratch_operands = 0 : i64, tpu.core_type = #tpu.core_type<tc>, window_params = [{transform_indices = @transform_0, window_bounds = array<i64: 2, 256>}, {transform_indices = @transform_1, window_bounds = array<i64: 1, 256>}, {transform_indices = @transform_2, window_bounds = array<i64: 2, 256>}]} {
    %c0 = arith.constant 0 : index
    %c0_0 = arith.constant 0 : index
    %0 = vector.load %arg2[%c0, %c0_0] : memref<2x256xf32, #tpu.memory_space<vmem>>, vector<2x256xf32>
    %c0_1 = arith.constant 0 : index
    %c0_2 = arith.constant 0 : index
    %1 = vector.load %arg3[%c0_1, %c0_2] : memref<1x256xf32, #tpu.memory_space<vmem>>, vector<1x256xf32>
    %2 = vector.broadcast %1 : vector<1x256xf32> to vector<2x256xf32>
    %3 = arith.addf %0, %2 : vector<2x256xf32>
    %c0_3 = arith.constant 0 : index
    %c0_4 = arith.constant 0 : index
    %4 = vector.load %arg4[%c0_3, %c0_4] : memref<2x256xf32, #tpu.memory_space<vmem>>, vector<2x256xf32>
    tpu.vector_store %arg4[%c0_3, %c0_4], %3 {strides = array<i32>} : memref<2x256xf32, #tpu.memory_space<vmem>>, vector<2x256xf32>,
    return
  }
  func.func @transform_0(%arg0: i32, %arg1: i32) -> (i32, i32) {
    %c0_i32 = arith.constant 0 : i32
    return %arg1, %arg0 : i32, i32
  }
  func.func @transform_1(%arg0: i32, %arg1: i32) -> (i32, i32) {
    %c0_i32 = arith.constant 0 : i32
    %c0_i32_0 = arith.constant 0 : i32
    return %c0_i32, %arg0 : i32, i32
  }
  func.func @transform_2(%arg0: i32, %arg1: i32) -> (i32, i32) {
    %c0_i32 = arith.constant 0 : i32
    return %arg1, %arg0 : i32, i32
  }
}

</mosaic_0001>

<bundles_post_ra>
// kernel: tpu_custom_call.1
= control target key start
LH: loop header
LB: loop body
LE: loop exit
PB: predicated region body
PF: predicated region fallthrough
CT: control target
= control target key end

     0   :  { %7 = vsyncpa [#allocation3], 0  ;;  %s215_s0 = inlined_call_operand.hbm [shape: f32[2,256], index: 0, kind: input, shape index: {}]   ;;  %s216_s1 = inlined_call_operand.hbm [shape: f32[1,2048], index: 1, kind: input, shape index: {}]   ;;  %s217_s2 = inlined_call_operand.hbm [shape: f32[2,256], index: 2, kind: output, shape index: {}]  }
   0x1   :  { %8 = vsyncpa [#allocation6], 0 }
   0x2   :  { %9 = vsyncpa [#allocation4], 0  ;;  %s150_s9 = smov [#allocation2]   ;;  %s151_s11 = smov [#allocation5]  }
   0x3   :  { %s16_s10 = sshll.u32 %s150_s9, 4  ;;  %s26_s12 = sshll.u32 %s151_s11, 4  ;;  %s17_s10 = int_to_ptr.vmem [resolvable:$true] %s16_s10  ;;  %s169_s12 = int_to_ptr.vmem [resolvable:$true] %s26_s12 }
   0x4   :  { %s78_s15 = scalar_lea.hbm %s215_s0, 64 }
   0x5   :  { %p79_p0 = scmp.ne.s32.totalorder %s215_s0, %s78_s15  ;;  %p82_p1 = scmp.lt.u32.totalorder %s78_s15, %s215_s0 }
   0x7   :  { %p84_p2 = pnand %p82_p1, %p79_p0 }
   0x9   :  { %87 = shalt.err (!%p84_p2)
}
   0xa   :  { %s88_s20 = scalar_lea.vmem %s17_s10, 64  ;;  %p93_p4 = scmp.lt.s32.totalorder %s17_s10, %s17_s10 }
   0xb   :  { %p89_p3 = scmp.ne.s32.totalorder %s17_s10, %s88_s20  ;;  %p94_p5 = scmp.lt.s32.totalorder %s88_s20, %s88_s20 }
   0xd   :  { %p95_p6 = por %p94_p5, %p93_p4 }
   0xf   :  { %p96_p7 = pnand %p95_p6, %p89_p3 }
  0x11   :  { %99 = shalt.err (!%p96_p7)
}
  0x12   :  { %19 = dma.hbm_to_vmem [thread:$0]  %s215_s0, 64, %s17_s10, [#allocation3]  }
  0x13   :  { %s100_s25 = scalar_lea.hbm %s216_s1, 32  ;;  %s102_s30 = scalar_lea.hbm %s216_s1, 256 }
  0x14   :  { %p101_p8 = scmp.ne.s32.totalorder %s216_s1, %s100_s25  ;;  %p103_p9 = scmp.lt.u32.totalorder %s102_s30, %s100_s25 }
  0x15   :  { %p104_p10 = scmp.lt.u32.totalorder %s100_s25, %s216_s1 }
  0x17   :  { %p105_p11 = por %p104_p10, %p103_p9 }
  0x19   :  { %p106_p12 = pnand %p105_p11, %p101_p8 }
  0x1b   :  { %109 = shalt.err (!%p106_p12)
}
  0x1c   :  { %s110_s0 = scalar_lea.vmem %s169_s12, 32  ;;  %p115_p0 = scmp.lt.s32.totalorder %s169_s12, %s169_s12 }
  0x1d   :  { %p111_p13 = scmp.ne.s32.totalorder %s169_s12, %s110_s0  ;;  %p116_p1 = scmp.lt.s32.totalorder %s110_s0, %s110_s0 }
  0x1f   :  { %p117_p2 = por %p116_p1, %p115_p0 }
  0x21   :  { %p118_p3 = pnand %p117_p2, %p111_p13 }
  0x23   :  { %121 = shalt.err (!%p118_p3)
}
  0x24   :  { %29 = dma.hbm_to_vmem [thread:$0]  %s216_s1, 32, %s169_s12, [#allocation6]  }
  0x25   :  { %144 = dma.done.wait [#allocation3], 64  }
  0x26   :  { %145 = vsyncadd [#allocation3], 4294967232 }
  0x27   :  { %146 = dma.done.wait [#allocation6], 32  }
  0x28   :  { %147 = vsyncadd [#allocation6], 4294967264  ;;  %v39_v0 = vlaneseq  ;;  %v152_v1 = vmov 1983009808   ;;  %v37_v7 = vld [vmem:[#allocation5] sm:$0x3] }
  0x29   :  { %v49_v2 = vunpack.c.l.s4 %v152_v1  ;;  %v36_v12 = vld [vmem:[#allocation2] sm:$0xf]  ;;  %s153_s7 = smov [#allocation7]  }
  0x2a   :  { %v40_v3 = vshrl.u32 %v39_v0, 7  ;;  %s64_s8 = sshll.u32 %s153_s7, 4  ;;  %s65_s8 = int_to_ptr.vmem [resolvable:$true] %s64_s8 }
  0x2b   :  { %v50_v6 = vunpack.c.0.s8 %v49_v2  ;;  %s122_s1 = scalar_lea.vmem %s65_s8, 64  ;;  %p127_p5 = scmp.lt.s32.totalorder %s65_s8, %s65_s8 }
  0x2c   :  { %v41_v4 = vsub.s32 0, %v40_v3  ;;  %v45_v5 = vsub.s32 1, %v40_v3  ;;  %p123_p4 = scmp.ne.s32.totalorder %s65_s8, %s122_s1  ;;  %p128_p6 = scmp.lt.s32.totalorder %s122_s1, %s122_s1 }
  0x2d   :  { %v53_v10 = vsub.s32 %v50_v6, %v40_v3 }
  0x2e   :  { %v42_v8 = vrot.slane %v37_v7, %v41_v4  ;;  %v46_v9 = vrot.slane %v37_v7, %v45_v5  ;;  %p129_p7 = por %p128_p6, %p127_p5 }
  0x30   :  { %v47_v11 = vcombine.low %v42_v8, %v46_v9  ;;  %p130_p8 = pnand %p129_p7, %p123_p4 }
  0x32   :  { %v54_v13 = vrot.slane %v47_v11, %v53_v10 }
  0x34   :  { %v56_v14 = vadd.f32 %v54_v13, %v36_v12 }
  0x36   :  { %57 = vst [vmem:[#allocation7] sm:$0xf] %v56_v14 }
  0x37   :  { %133 = shalt.err (!%p130_p8)
}
  0x38   :  { %s134_s11 = scalar_lea.hbm %s217_s2, 64 }
  0x39   :  { %p135_p9 = scmp.ne.s32.totalorder %s217_s2, %s134_s11  ;;  %p138_p10 = scmp.lt.u32.totalorder %s134_s11, %s217_s2 }
  0x3b   :  { %p140_p11 = pnand %p138_p10, %p135_p9 }
  0x3d   :  { %143 = shalt.err (!%p140_p11)
}
  0x3e   :  { %67 = dma.vmem_to_hbm [thread:$0]  %s65_s8, 64, %s217_s2, [#allocation4]  }
  0x3f   :  { %148 = dma.done.wait [#allocation4], 64  }
  0x40   :  { %149 = vsyncadd [#allocation4], 4294967232 }
  0x41   :  { %71 = vsyncpa [#allocation3], 1 }
  0x42   :  { %72 = vsyncpa [#allocation6], 1 }
  0x43   :  { %73 = vsyncpa [#allocation4], 1 }

</bundles_post_ra>
